<compile_context>
chip_gen: v5e
topology: v5e:2x2
jax: 0.10.0
libtpu: 0.0.40
codegen_flags: <defaults>
</compile_context>

<pallas_src>
import math
from functools import partial

import jax
import jax.numpy as jnp
from jax import lax
from jax.experimental import pallas as pl
from jax.experimental.pallas import tpu as pltpu

EPS_LN = 1e-5  # nn.LayerNorm default eps


def _layernorm(x, gamma, beta):
    mu = jnp.mean(x, axis=-1, keepdims=True)
    var = jnp.mean((x - mu) ** 2, axis=-1, keepdims=True)
    return (x - mu) * lax.rsqrt(var + EPS_LN) * gamma + beta


def _gelu_exact(x):
    # PyTorch nn.GELU default is the exact erf formulation.
    return 0.5 * x * (1.0 + lax.erf(x * (1.0 / math.sqrt(2.0))))


def basic_transformer_kernel(
    x_ref,                                    # (B*S, D)
    g1_ref, b1_ref,                           # norm1 gamma/beta (1, D)
    wqkv_ref,                                 # fused Q/K/V weight (D, 3*A); q cols pre-scaled
    wo_ref, bo_ref,                           # to_out weight (A, D) / bias (1, D)
    g2_ref, b2_ref,                           # norm2 gamma/beta (1, D)
    wf1_ref, bf1_ref, wf2_ref, bf2_ref,       # feed-forward weights
    o_ref,                                    # (B*S, D)
    *, n_heads, d_head, batch, seq,
):
    B, S, H, DH = batch, seq, n_heads, d_head
    A = H * DH
    BS = B * S

    x = x_ref[...]                            # already a lane/sublane-dense (B*S, D) slab

    # ---------------- norm1 ----------------
    h = _layernorm(x, g1_ref[...], b1_ref[...])

    # ------- fused Q/K/V projection: one MXU pass; scale folded into weights -------
    qkv = jnp.dot(h, wqkv_ref[...], preferred_element_type=jnp.float32)   # (BS, 3A)

    # ------- head-batched attention: (H*B, S, DH) batch-major slabs -------
    def split_heads(t2):                      # (BS, A) -> (H*B, S, DH), head-major leading dim
        t3 = t2.reshape(B, S, A)
        return jnp.concatenate(
            [t3[..., hd * DH:(hd + 1) * DH] for hd in range(H)], axis=0)

    qh = split_heads(qkv[:, :A])
    kh = split_heads(qkv[:, A:2 * A])
    vh = split_heads(qkv[:, 2 * A:])

    # ONE batched scores matmul + ONE softmax + ONE batched p@v matmul.
    s = jnp.einsum('gqd,gkd->gqk', qh, kh, preferred_element_type=jnp.float32)  # (HB, S, S)
    s = s - jnp.max(s, axis=-1, keepdims=True)
    p = jnp.exp(s)
    p = p / jnp.sum(p, axis=-1, keepdims=True)        # exact divide (accuracy back to 1e-4)
    o = jnp.einsum('gqk,gkd->gqd', p, vh, preferred_element_type=jnp.float32)   # (HB, S, DH)

    # un-head-batch back to (BS, A): leading slices + one lane concat
    attn = jnp.concatenate([o[hd * B:(hd + 1) * B] for hd in range(H)], axis=-1)  # (B, S, A)
    attn = attn.reshape(BS, A)

    # ------- output projection + residual (dropout p=0.1 -> identity, eval) -------
    attn = jnp.dot(attn, wo_ref[...], preferred_element_type=jnp.float32) + bo_ref[...]
    x1 = x + attn

    # ------- norm2 + FeedForward (Linear -> exact GELU -> Linear) + residual -------
    h2 = _layernorm(x1, g2_ref[...], b2_ref[...])
    ff = jnp.dot(h2, wf1_ref[...], preferred_element_type=jnp.float32) + bf1_ref[...]
    ff = _gelu_exact(ff)
    ff = jnp.dot(ff, wf2_ref[...], preferred_element_type=jnp.float32) + bf2_ref[...]

    o_ref[...] = (x1 + ff).astype(o_ref.dtype)


def prepare_params(params, *, d_head):
    """One-time weight preprocessing (NOT in the per-call path):
    fold the attention scale into the q columns and fuse the Q/K/V weights."""
    g1, b1, wq, wk, wv, wo, bo, g2, b2, wf1, bf1, wf2, bf2 = params
    scale = d_head ** -0.5
    wqkv = jnp.concatenate([wq * scale, wk, wv], axis=1)        # (D, 3*A)
    return (g1, b1, wqkv, wo, bo, g2, b2, wf1, bf1, wf2, bf2)


def basic_transformer(x, prepared_params, *, n_heads, d_head):
    """x: (B, S, D) float32; prepared_params from prepare_params()."""
    B, S, D = x.shape
    kernel = partial(basic_transformer_kernel,
                     n_heads=n_heads, d_head=d_head, batch=B, seq=S)

    vmem = lambda: pl.BlockSpec(memory_space=pltpu.MemorySpace.VMEM)
    args = (x.reshape(B * S, D),) + tuple(prepared_params)

    out = pl.pallas_call(
        kernel,
        out_shape=jax.ShapeDtypeStruct((B * S, D), x.dtype),
        # Single invocation (grid=()) — whole batch resident in VMEM (<100 KiB).
        in_specs=[vmem() for _ in args],
        out_specs=vmem(),
    )(*args)
    return out.reshape(B, S, D)


def make_params(key, d_model, n_heads, d_head):
    """Deterministic synthetic parameters (shapes match the PyTorch module)."""
    H = 4 * d_model                 # FeedForward hidden size (d_mult=4)
    A = n_heads * d_head            # d_attn
    ks = jax.random.split(key, 13)
    s = 0.05
    g1 = 1.0 + s * jax.random.normal(ks[0], (1, d_model), jnp.float32)
    b1 = s * jax.random.normal(ks[1], (1, d_model), jnp.float32)
    wq = s * jax.random.normal(ks[2], (d_model, A), jnp.float32)   # to_q (no bias)
    wk = s * jax.random.normal(ks[3], (d_model, A), jnp.float32)   # to_k (no bias)
    wv = s * jax.random.normal(ks[4], (d_model, A), jnp.float32)   # to_v (no bias)
    wo = s * jax.random.normal(ks[5], (A, d_model), jnp.float32)   # to_out weight
    bo = s * jax.random.normal(ks[6], (1, d_model), jnp.float32)   # to_out bias
    g2 = 1.0 + s * jax.random.normal(ks[7], (1, d_model), jnp.float32)
    b2 = s * jax.random.normal(ks[8], (1, d_model), jnp.float32)
    wf1 = s * jax.random.normal(ks[9], (d_model, H), jnp.float32)
    bf1 = s * jax.random.normal(ks[10], (1, H), jnp.float32)
    wf2 = s * jax.random.normal(ks[11], (H, d_model), jnp.float32)
    bf2 = s * jax.random.normal(ks[12], (1, d_model), jnp.float32)
    return (g1, b1, wq, wk, wv, wo, bo, g2, b2, wf1, bf1, wf2, bf2)


def reference(x, params, n_heads, d_head):
    """Pure-JAX reference mirroring the PyTorch forward (dropout = identity)."""
    g1, b1, wq, wk, wv, wo, bo, g2, b2, wf1, bf1, wf2, bf2 = params
    B, S, D = x.shape

    def ln(z, g, b):
        mu = jnp.mean(z, -1, keepdims=True)
        var = jnp.mean((z - mu) ** 2, -1, keepdims=True)
        return (z - mu) / jnp.sqrt(var + EPS_LN) * g + b

    h = ln(x, g1, b1)
    q = (h @ wq).reshape(B, S, n_heads, d_head)
    k = (h @ wk).reshape(B, S, n_heads, d_head)
    v = (h @ wv).reshape(B, S, n_heads, d_head)
    attn = jnp.einsum("bihd,bjhd->bhij", q, k) * (d_head ** -0.5)
    attn = jax.nn.softmax(attn, axis=-1)
    out = jnp.einsum("bhij,bjhd->bihd", attn, v).reshape(B, S, n_heads * d_head)
    out = out @ wo + bo
    x1 = x + out
    h2 = ln(x1, g2, b2)
    ff = jax.nn.gelu(h2 @ wf1 + bf1, approximate=False) @ wf2 + bf2
    return x1 + ff


if __name__ == "__main__":
    key = jax.random.PRNGKey(0)
    kx, kp = jax.random.split(key)

    B, S, D = 2, 8, 32          # batch, seq_len, d_model
    NH, DH = 4, 8               # n_heads, d_head  (d_attn = 32)
    x = jax.random.normal(kx, (B, S, D), jnp.float32)
    params = make_params(kp, D, NH, DH)
    prepared = prepare_params(params, d_head=DH)   # one-time weight prep (fused, pre-scaled)

    out = basic_transformer(x, prepared, n_heads=NH, d_head=DH)
    out = jax.block_until_ready(out)

    ref = reference(x, params, NH, DH)
    assert out.shape == (B, S, D)
    err = float(jnp.max(jnp.abs(out - ref)))
    assert jnp.allclose(out, ref, atol=1e-4, rtol=1e-4), \
        f"mismatch vs reference (max abs err {err})"

    print("KERNEL_OK")
</pallas_src>

<mosaic_0001>
module attributes {stable_mosaic.version = 11 : i64} {
  func.func @basic_transformer_kernel(%arg0: memref<16x32xf32, #tpu.memory_space<vmem>>, %arg1: memref<1x32xf32, #tpu.memory_space<vmem>>, %arg2: memref<1x32xf32, #tpu.memory_space<vmem>>, %arg3: memref<32x96xf32, #tpu.memory_space<vmem>>, %arg4: memref<32x32xf32, #tpu.memory_space<vmem>>, %arg5: memref<1x32xf32, #tpu.memory_space<vmem>>, %arg6: memref<1x32xf32, #tpu.memory_space<vmem>>, %arg7: memref<1x32xf32, #tpu.memory_space<vmem>>, %arg8: memref<32x128xf32, #tpu.memory_space<vmem>>, %arg9: memref<1x128xf32, #tpu.memory_space<vmem>>, %arg10: memref<128x32xf32, #tpu.memory_space<vmem>>, %arg11: memref<1x32xf32, #tpu.memory_space<vmem>>, %arg12: memref<16x32xf32, #tpu.memory_space<vmem>>) attributes {dimension_semantics = [], scalar_prefetch = 0 : i64, scratch_operands = 0 : i64, tpu.core_type = #tpu.core_type<tc>} {
    %c0 = arith.constant 0 : index
    %c0_0 = arith.constant 0 : index
    %0 = vector.load %arg0[%c0, %c0_0] : memref<16x32xf32, #tpu.memory_space<vmem>>, vector<16x32xf32>
    %c0_1 = arith.constant 0 : index
    %c0_2 = arith.constant 0 : index
    %1 = vector.load %arg1[%c0_1, %c0_2] : memref<1x32xf32, #tpu.memory_space<vmem>>, vector<1x32xf32>
    %c0_3 = arith.constant 0 : index
    %c0_4 = arith.constant 0 : index
    %2 = vector.load %arg2[%c0_3, %c0_4] : memref<1x32xf32, #tpu.memory_space<vmem>>, vector<1x32xf32>
    %cst = arith.constant dense<0.000000e+00> : vector<16xf32>
    %3 = vector.multi_reduction <add>, %0, %cst [1] : vector<16x32xf32> to vector<16xf32>
    %4 = vector.shape_cast %3 : vector<16xf32> to vector<16x1xf32>
    %cst_5 = arith.constant 3.200000e+01 : f32
    %5 = vector.broadcast %cst_5 : f32 to vector<16x1xf32>
    %6 = arith.divf %4, %5 : vector<16x1xf32>
    %7 = vector.broadcast %6 : vector<16x1xf32> to vector<16x32xf32>
    %8 = arith.subf %0, %7 : vector<16x32xf32>
    %9 = arith.mulf %8, %8 : vector<16x32xf32>
    %cst_6 = arith.constant dense<0.000000e+00> : vector<16xf32>
    %10 = vector.multi_reduction <add>, %9, %cst_6 [1] : vector<16x32xf32> to vector<16xf32>
    %11 = vector.shape_cast %10 : vector<16xf32> to vector<16x1xf32>
    %cst_7 = arith.constant 3.200000e+01 : f32
    %12 = vector.broadcast %cst_7 : f32 to vector<16x1xf32>
    %13 = arith.divf %11, %12 : vector<16x1xf32>
    %14 = vector.broadcast %6 : vector<16x1xf32> to vector<16x32xf32>
    %15 = arith.subf %0, %14 : vector<16x32xf32>
    %cst_8 = arith.constant 9.99999974E-6 : f32
    %16 = vector.broadcast %cst_8 : f32 to vector<16x1xf32>
    %17 = arith.addf %13, %16 : vector<16x1xf32>
    %18 = math.rsqrt %17 : vector<16x1xf32>
    %19 = vector.broadcast %18 : vector<16x1xf32> to vector<16x32xf32>
    %20 = arith.mulf %15, %19 : vector<16x32xf32>
    %21 = vector.broadcast %1 : vector<1x32xf32> to vector<16x32xf32>
    %22 = arith.mulf %20, %21 : vector<16x32xf32>
    %23 = vector.broadcast %2 : vector<1x32xf32> to vector<16x32xf32>
    %24 = arith.addf %22, %23 : vector<16x32xf32>
    %c0_9 = arith.constant 0 : index
    %c0_10 = arith.constant 0 : index
    %25 = vector.load %arg3[%c0_9, %c0_10] : memref<32x96xf32, #tpu.memory_space<vmem>>, vector<32x96xf32>
    %cst_11 = arith.constant dense<0.000000e+00> : vector<16x96xf32>
    %26 = tpu.matmul %24, %25, %cst_11 {dimension_numbers = #tpu.dot_dimension_numbers<[1], [0], [0], [1], [0, 0, 1, 1], [], []>} : vector<16x32xf32>, vector<32x96xf32>, vector<16x96xf32> -> vector<16x96xf32>
    %27 = vector.extract_strided_slice %26 {offsets = [0, 0], sizes = [16, 32], strides = [1, 1]} : vector<16x96xf32> to vector<16x32xf32>
    %28 = vector.shape_cast %27 : vector<16x32xf32> to vector<2x8x32xf32>
    %29 = vector.extract_strided_slice %28 {offsets = [0, 0, 0], sizes = [2, 8, 8], strides = [1, 1, 1]} : vector<2x8x32xf32> to vector<2x8x8xf32>
    %30 = vector.extract_strided_slice %28 {offsets = [0, 0, 8], sizes = [2, 8, 8], strides = [1, 1, 1]} : vector<2x8x32xf32> to vector<2x8x8xf32>
    %31 = vector.extract_strided_slice %28 {offsets = [0, 0, 16], sizes = [2, 8, 8], strides = [1, 1, 1]} : vector<2x8x32xf32> to vector<2x8x8xf32>
    %32 = vector.extract_strided_slice %28 {offsets = [0, 0, 24], sizes = [2, 8, 8], strides = [1, 1, 1]} : vector<2x8x32xf32> to vector<2x8x8xf32>
    %33 = tpu.concatenate %29, %30, %31, %32 in 0 : vector<2x8x8xf32>, vector<2x8x8xf32>, vector<2x8x8xf32>, vector<2x8x8xf32> -> vector<8x8x8xf32>
    %34 = vector.extract_strided_slice %26 {offsets = [0, 32], sizes = [16, 32], strides = [1, 1]} : vector<16x96xf32> to vector<16x32xf32>
    %35 = vector.shape_cast %34 : vector<16x32xf32> to vector<2x8x32xf32>
    %36 = vector.extract_strided_slice %35 {offsets = [0, 0, 0], sizes = [2, 8, 8], strides = [1, 1, 1]} : vector<2x8x32xf32> to vector<2x8x8xf32>
    %37 = vector.extract_strided_slice %35 {offsets = [0, 0, 8], sizes = [2, 8, 8], strides = [1, 1, 1]} : vector<2x8x32xf32> to vector<2x8x8xf32>
    %38 = vector.extract_strided_slice %35 {offsets = [0, 0, 16], sizes = [2, 8, 8], strides = [1, 1, 1]} : vector<2x8x32xf32> to vector<2x8x8xf32>
    %39 = vector.extract_strided_slice %35 {offsets = [0, 0, 24], sizes = [2, 8, 8], strides = [1, 1, 1]} : vector<2x8x32xf32> to vector<2x8x8xf32>
    %40 = tpu.concatenate %36, %37, %38, %39 in 0 : vector<2x8x8xf32>, vector<2x8x8xf32>, vector<2x8x8xf32>, vector<2x8x8xf32> -> vector<8x8x8xf32>
    %41 = vector.extract_strided_slice %26 {offsets = [0, 64], sizes = [16, 32], strides = [1, 1]} : vector<16x96xf32> to vector<16x32xf32>
    %42 = vector.shape_cast %41 : vector<16x32xf32> to vector<2x8x32xf32>
    %43 = vector.extract_strided_slice %42 {offsets = [0, 0, 0], sizes = [2, 8, 8], strides = [1, 1, 1]} : vector<2x8x32xf32> to vector<2x8x8xf32>
    %44 = vector.extract_strided_slice %42 {offsets = [0, 0, 8], sizes = [2, 8, 8], strides = [1, 1, 1]} : vector<2x8x32xf32> to vector<2x8x8xf32>
    %45 = vector.extract_strided_slice %42 {offsets = [0, 0, 16], sizes = [2, 8, 8], strides = [1, 1, 1]} : vector<2x8x32xf32> to vector<2x8x8xf32>
    %46 = vector.extract_strided_slice %42 {offsets = [0, 0, 24], sizes = [2, 8, 8], strides = [1, 1, 1]} : vector<2x8x32xf32> to vector<2x8x8xf32>
    %47 = tpu.concatenate %43, %44, %45, %46 in 0 : vector<2x8x8xf32>, vector<2x8x8xf32>, vector<2x8x8xf32>, vector<2x8x8xf32> -> vector<8x8x8xf32>
    "tpu.trace_start"() <{level = 10 : i32, message = "gqd,gkd->gqk"}> : () -> ()
    %cst_12 = arith.constant dense<0.000000e+00> : vector<8x8x8xf32>
    %48 = tpu.matmul %33, %40, %cst_12 {dimension_numbers = #tpu.dot_dimension_numbers<[2], [2], [1], [1], [0, 0, 0, 1, 1, 1], [0], [0]>} : vector<8x8x8xf32>, vector<8x8x8xf32>, vector<8x8x8xf32> -> vector<8x8x8xf32>
    "tpu.trace_stop"() : () -> ()
    %cst_13 = arith.constant dense<0xFF800000> : vector<8x8xf32>
    %49 = vector.multi_reduction <maximumf>, %48, %cst_13 [2] : vector<8x8x8xf32> to vector<8x8xf32>
    %50 = vector.shape_cast %49 : vector<8x8xf32> to vector<8x8x1xf32>
    %51 = vector.broadcast %50 : vector<8x8x1xf32> to vector<8x8x8xf32>
    %52 = arith.subf %48, %51 : vector<8x8x8xf32>
    %53 = math.exp %52 : vector<8x8x8xf32>
    %cst_14 = arith.constant dense<0.000000e+00> : vector<8x8xf32>
    %54 = vector.multi_reduction <add>, %53, %cst_14 [2] : vector<8x8x8xf32> to vector<8x8xf32>
    %55 = vector.shape_cast %54 : vector<8x8xf32> to vector<8x8x1xf32>
    %56 = vector.broadcast %55 : vector<8x8x1xf32> to vector<8x8x8xf32>
    %57 = arith.divf %53, %56 : vector<8x8x8xf32>
    "tpu.trace_start"() <{level = 10 : i32, message = "gqk,gkd->gqd"}> : () -> ()
    %cst_15 = arith.constant dense<0.000000e+00> : vector<8x8x8xf32>
    %58 = tpu.matmul %57, %47, %cst_15 {dimension_numbers = #tpu.dot_dimension_numbers<[2], [1], [1], [2], [0, 0, 0, 1, 1, 2], [0], [0]>} : vector<8x8x8xf32>, vector<8x8x8xf32>, vector<8x8x8xf32> -> vector<8x8x8xf32>
    "tpu.trace_stop"() : () -> ()
    %59 = vector.extract_strided_slice %58 {offsets = [0, 0, 0], sizes = [2, 8, 8], strides = [1, 1, 1]} : vector<8x8x8xf32> to vector<2x8x8xf32>
    %60 = vector.extract_strided_slice %58 {offsets = [2, 0, 0], sizes = [2, 8, 8], strides = [1, 1, 1]} : vector<8x8x8xf32> to vector<2x8x8xf32>
    %61 = vector.extract_strided_slice %58 {offsets = [4, 0, 0], sizes = [2, 8, 8], strides = [1, 1, 1]} : vector<8x8x8xf32> to vector<2x8x8xf32>
    %62 = vector.extract_strided_slice %58 {offsets = [6, 0, 0], sizes = [2, 8, 8], strides = [1, 1, 1]} : vector<8x8x8xf32> to vector<2x8x8xf32>
    %63 = tpu.concatenate %59, %60, %61, %62 in 2 : vector<2x8x8xf32>, vector<2x8x8xf32>, vector<2x8x8xf32>, vector<2x8x8xf32> -> vector<2x8x32xf32>
    %64 = vector.shape_cast %63 : vector<2x8x32xf32> to vector<16x32xf32>
    %c0_16 = arith.constant 0 : index
    %c0_17 = arith.constant 0 : index
    %65 = vector.load %arg4[%c0_16, %c0_17] : memref<32x32xf32, #tpu.memory_space<vmem>>, vector<32x32xf32>
    %cst_18 = arith.constant dense<0.000000e+00> : vector<16x32xf32>
    %66 = tpu.matmul %64, %65, %cst_18 {dimension_numbers = #tpu.dot_dimension_numbers<[1], [0], [0], [1], [0, 0, 1, 1], [], []>} : vector<16x32xf32>, vector<32x32xf32>, vector<16x32xf32> -> vector<16x32xf32>
    %c0_19 = arith.constant 0 : index
    %c0_20 = arith.constant 0 : index
    %67 = vector.load %arg5[%c0_19, %c0_20] : memref<1x32xf32, #tpu.memory_space<vmem>>, vector<1x32xf32>
    %68 = vector.broadcast %67 : vector<1x32xf32> to vector<16x32xf32>
    %69 = arith.addf %66, %68 : vector<16x32xf32>
    %70 = arith.addf %0, %69 : vector<16x32xf32>
    %c0_21 = arith.constant 0 : index
    %c0_22 = arith.constant 0 : index
    %71 = vector.load %arg6[%c0_21, %c0_22] : memref<1x32xf32, #tpu.memory_space<vmem>>, vector<1x32xf32>
    %c0_23 = arith.constant 0 : index
    %c0_24 = arith.constant 0 : index
    %72 = vector.load %arg7[%c0_23, %c0_24] : memref<1x32xf32, #tpu.memory_space<vmem>>, vector<1x32xf32>
    %cst_25 = arith.constant dense<0.000000e+00> : vector<16xf32>
    %73 = vector.multi_reduction <add>, %70, %cst_25 [1] : vector<16x32xf32> to vector<16xf32>
    %74 = vector.shape_cast %73 : vector<16xf32> to vector<16x1xf32>
    %cst_26 = arith.constant 3.200000e+01 : f32
    %75 = vector.broadcast %cst_26 : f32 to vector<16x1xf32>
    %76 = arith.divf %74, %75 : vector<16x1xf32>
    %77 = vector.broadcast %76 : vector<16x1xf32> to vector<16x32xf32>
    %78 = arith.subf %70, %77 : vector<16x32xf32>
    %79 = arith.mulf %78, %78 : vector<16x32xf32>
    %cst_27 = arith.constant dense<0.000000e+00> : vector<16xf32>
    %80 = vector.multi_reduction <add>, %79, %cst_27 [1] : vector<16x32xf32> to vector<16xf32>
    %81 = vector.shape_cast %80 : vector<16xf32> to vector<16x1xf32>
    %cst_28 = arith.constant 3.200000e+01 : f32
    %82 = vector.broadcast %cst_28 : f32 to vector<16x1xf32>
    %83 = arith.divf %81, %82 : vector<16x1xf32>
    %84 = vector.broadcast %76 : vector<16x1xf32> to vector<16x32xf32>
    %85 = arith.subf %70, %84 : vector<16x32xf32>
    %cst_29 = arith.constant 9.99999974E-6 : f32
    %86 = vector.broadcast %cst_29 : f32 to vector<16x1xf32>
    %87 = arith.addf %83, %86 : vector<16x1xf32>
    %88 = math.rsqrt %87 : vector<16x1xf32>
    %89 = vector.broadcast %88 : vector<16x1xf32> to vector<16x32xf32>
    %90 = arith.mulf %85, %89 : vector<16x32xf32>
    %91 = vector.broadcast %71 : vector<1x32xf32> to vector<16x32xf32>
    %92 = arith.mulf %90, %91 : vector<16x32xf32>
    %93 = vector.broadcast %72 : vector<1x32xf32> to vector<16x32xf32>
    %94 = arith.addf %92, %93 : vector<16x32xf32>
    %c0_30 = arith.constant 0 : index
    %c0_31 = arith.constant 0 : index
    %95 = vector.load %arg8[%c0_30, %c0_31] : memref<32x128xf32, #tpu.memory_space<vmem>>, vector<32x128xf32>
    %cst_32 = arith.constant dense<0.000000e+00> : vector<16x128xf32>
    %96 = tpu.matmul %94, %95, %cst_32 {dimension_numbers = #tpu.dot_dimension_numbers<[1], [0], [0], [1], [0, 0, 1, 1], [], []>} : vector<16x32xf32>, vector<32x128xf32>, vector<16x128xf32> -> vector<16x128xf32>
    %c0_33 = arith.constant 0 : index
    %c0_34 = arith.constant 0 : index
    %97 = vector.load %arg9[%c0_33, %c0_34] : memref<1x128xf32, #tpu.memory_space<vmem>>, vector<1x128xf32>
    %98 = vector.broadcast %97 : vector<1x128xf32> to vector<16x128xf32>
    %99 = arith.addf %96, %98 : vector<16x128xf32>
    %cst_35 = arith.constant 5.000000e-01 : f32
    %100 = vector.broadcast %cst_35 : f32 to vector<16x128xf32>
    %101 = arith.mulf %100, %99 : vector<16x128xf32>
    %cst_36 = arith.constant 0.707106769 : f32
    %102 = vector.broadcast %cst_36 : f32 to vector<16x128xf32>
    %103 = arith.mulf %99, %102 : vector<16x128xf32>
    %104 = math.erf %103 : vector<16x128xf32>
    %cst_37 = arith.constant 1.000000e+00 : f32
    %105 = vector.broadcast %cst_37 : f32 to vector<16x128xf32>
    %106 = arith.addf %105, %104 : vector<16x128xf32>
    %107 = arith.mulf %101, %106 : vector<16x128xf32>
    %c0_38 = arith.constant 0 : index
    %c0_39 = arith.constant 0 : index
    %108 = vector.load %arg10[%c0_38, %c0_39] : memref<128x32xf32, #tpu.memory_space<vmem>>, vector<128x32xf32>
    %cst_40 = arith.constant dense<0.000000e+00> : vector<16x32xf32>
    %109 = tpu.matmul %107, %108, %cst_40 {dimension_numbers = #tpu.dot_dimension_numbers<[1], [0], [0], [1], [0, 0, 1, 1], [], []>} : vector<16x128xf32>, vector<128x32xf32>, vector<16x32xf32> -> vector<16x32xf32>
    %c0_41 = arith.constant 0 : index
    %c0_42 = arith.constant 0 : index
    %110 = vector.load %arg11[%c0_41, %c0_42] : memref<1x32xf32, #tpu.memory_space<vmem>>, vector<1x32xf32>
    %111 = vector.broadcast %110 : vector<1x32xf32> to vector<16x32xf32>
    %112 = arith.addf %109, %111 : vector<16x32xf32>
    %113 = arith.addf %70, %112 : vector<16x32xf32>
    %c0_43 = arith.constant 0 : index
    %c0_44 = arith.constant 0 : index
    %114 = vector.load %arg12[%c0_43, %c0_44] : memref<16x32xf32, #tpu.memory_space<vmem>>, vector<16x32xf32>
    tpu.vector_store %arg12[%c0_43, %c0_44], %113 {strides = array<i32>} : memref<16x32xf32, #tpu.memory_space<vmem>>, vector<16x32xf32>,
    return
  }
}

</mosaic_0001>

<bundles_post_ra>
// kernel: tpu_custom_call.1
= control target key start
LH: loop header
LB: loop body
LE: loop exit
PB: predicated region body
PF: predicated region fallthrough
CT: control target
= control target key end

     0   :  { %vm46_vm0 = vcmask 261120   ;;  %s1606_s0 = inlined_call_operand.vmem [shape: f32[16,32], index: 0, kind: input, shape index: {}]   ;;  %s1607_s1 = inlined_call_operand.vmem [shape: f32[1,32], index: 1, kind: input, shape index: {}]   ;;  %s1608_s2 = inlined_call_operand.vmem [shape: f32[1,32], index: 2, kind: input, shape index: {}]   ;;  %s1609_s3 = inlined_call_operand.vmem [shape: f32[32,96], index: 3, kind: input, shape index: {}]   ;;  %s1610_s4 = inlined_call_operand.vmem [shape: f32[32,32], index: 4, kind: input, shape index: {}]   ;;  %s1611_s5 = inlined_call_operand.vmem [shape: f32[1,32], index: 5, kind: input, shape index: {}]   ;;  %s1612_s6 = inlined_call_operand.vmem [shape: f32[1,32], index: 6, kind: input, shape index: {}]   ;;  %s1613_s7 = inlined_call_operand.vmem [shape: f32[1,32], index: 7, kind: input, shape index: {}]   ;;  %s1614_s8 = inlined_call_operand.vmem [shape: f32[32,128], index: 8, kind: input, shape index: {}]   ;;  %s1615_s9 = inlined_call_operand.vmem [shape: f32[1,128], index: 9, kind: input, shape index: {}]   ;;  %s1616_s10 = inlined_call_operand.vmem [shape: f32[128,32], index: 10, kind: input, shape index: {}]   ;;  %s1617_s11 = inlined_call_operand.vmem [shape: f32[1,32], index: 11, kind: input, shape index: {}]   ;;  %s1618_s12 = inlined_call_operand.hbm [shape: f32[16,32], index: 12, kind: output, shape index: {}]  }
   0x1   :  { %v1297_v0 = vld [vmem:[%s1606_s0] sm:$0xff] }
   0x2   :  { %v47_v1 = vsel %vm46_vm0, %v1297_v0, 0.0 }
   0x3   :  { %48 = vadd.xlane.f32.xlu0 %v47_v1 }
   0x4   :  { %17 = vsyncpa [#allocation3], 0  ;;  %v1304_v2 = vld [vmem:[%s1606_s0 + $0x8] sm:$0xff]  ;;  %v1218_v4 = vmov 32.0   ;;  %v111_v21 = vld [vmem:[%s1609_s3 + $0x18] sm:$0xff]  ;;  %s1221_s17 = smov 96  }
   0x5   :  { %v50_v3 = vsel %vm46_vm0, %v1304_v2, 0.0  ;;  %1146 = vrcp.f32 %v1218_v4  ;;  %130 = vmatpush.msra.mxu0 %v111_v21  ;;  %v110_v22 = vld [vmem:[%s1609_s3 + $0x10] sm:$0xff]  ;;  %v109_v23 = vld [vmem:[%s1609_s3 + $0x8] sm:$0xff]  ;;  %v108_v24 = vld [vmem:[%s1609_s3] sm:$0xff]  ;;  %s1222_s18 = smov 104   ;;  %vm157_vm8 = vcmask 64512  }
   0x6   :  { %v1139_v39 = vld [vmem:[%s1607_s1] ss:$0 sm:$0xff]  ;;  %s1219_s1 = smov 120   ;;  %s1223_s19 = smov 64  }
   0x7   :  { %131 = vmatpush.msra.mxu0 %v110_v22  ;;  %v1140_v43 = vld [vmem:[%s1608_s2] ss:$0 sm:$0xff]  ;;  %s1220_s2 = smov 112   ;;  %s1224_s20 = smov 8  }
   0x8   :  { %s1225_s21 = smov 16   ;;  %s1226_s22 = smov 24  }
   0x9   :  { %132 = vmatpush.msra.mxu0 %v109_v23  ;;  %s1227_s26 = smov [#allocation2]  }
   0xa   :  { %s1067_s27 = sshll.u32 %s1227_s26, 4  ;;  %s1068_s27 = int_to_ptr.vmem [resolvable:$true] %s1067_s27 }
   0xb   :  { %51 = vadd.xlane.f32.xlu0 %v50_v3  ;;  %v1147_v5 = vpop.eup %1146  ;;  %133 = vmatpush.msra.mxu0 %v108_v24 }
   0xc   :  { %v54_v6 = vmul.f32 32.0, %v1147_v5  ;;  %vm58_vm1 = vweird.f32 %v1147_v5 }
   0xe   :  { %v55_v7 = vsub.f32 1.0, %v54_v6 }
  0x10   :  { %v56_v8 = vmul.f32 %v1147_v5, %v55_v7 }
  0x12   :  { %v57_v9 = vadd.f32 %v1147_v5, %v56_v8 }
  0x14   :  { %v1308_v10 = vsel %vm58_vm1, %v1147_v5, %v57_v9 }
  0x76   :  { %v49_v11 = vpop.xlane.xlu0 %48 }
  0x77   :  { %v60_v12 = vmul.f32 %v1308_v10, %v49_v11 }
  0x79   :  { %v62_v13 = vsub.f32 %v1297_v0, %v60_v12 }
  0x7b   :  { %v64_v14 = vmul.f32 %v62_v13, %v62_v13 }
  0x7d   :  { %v66_v15 = vsel %vm46_vm0, %v64_v14, 0.0 }
  0x7e   :  { %67 = vadd.xlane.f32.xlu1 %v66_v15  ;;  %v52_v16 = vpop.xlane.xlu0 %51 }
  0x7f   :  { %v61_v17 = vmul.f32 %v1308_v10, %v52_v16 }
  0x81   :  { %v63_v18 = vsub.f32 %v1304_v2, %v61_v17 }
  0x83   :  { %v65_v19 = vmul.f32 %v63_v18, %v63_v18 }
  0x85   :  { %v69_v20 = vsel %vm46_vm0, %v65_v19, 0.0 }
  0x86   :  { %70 = vadd.xlane.f32.xlu1 %v69_v20 }
  0xf1   :  { %v68_v25 = vpop.xlane.xlu1 %67 }
  0xf2   :  { %v72_v26 = vmul.f32 %v68_v25, %v1308_v10 }
  0xf4   :  { %v74_v27 = vadd.f32 1e-05, %v72_v26 }
  0xf6   :  { %1148 = vrsqrt.f32 %v74_v27  ;;  %vm82_vm3 = vweird.f32 %v74_v27 }
  0xf9   :  { %v71_v28 = vpop.xlane.xlu1 %70 }
  0xfa   :  { %v73_v29 = vmul.f32 %v71_v28, %v1308_v10 }
  0xfc   :  { %v1149_v30 = vpop.eup %1148  ;;  %v75_v31 = vadd.f32 1e-05, %v73_v29 }
  0xfd   :  { %v77_v32 = vmul.f32 %v1149_v30, %v74_v27  ;;  %vm83_vm2 = vweird.f32 %v1149_v30 }
  0xfe   :  { %1150 = vrsqrt.f32 %v75_v31  ;;  %vm84_vm4 = vmor %vm82_vm3, %vm83_vm2  ;;  %vm92_vm5 = vweird.f32 %v75_v31 }
  0xff   :  { %v78_v33 = vmul.f32 %v1149_v30, %v77_v32 }
 0x101   :  { %v79_v34 = vmul.f32 0.5, %v78_v33 }
 0x103   :  { %v80_v35 = vsub.f32 1.5, %v79_v34 }
 0x104   :  { %v1151_v36 = vpop.eup %1150 }
 0x105   :  { %v81_v37 = vmul.f32 %v1149_v30, %v80_v35  ;;  %v87_v38 = vmul.f32 %v1151_v36, %v75_v31  ;;  %vm93_vm6 = vweird.f32 %v1151_v36 }
 0x106   :  { %vm94_vm7 = vmor %vm92_vm5, %vm93_vm6 }
 0x107   :  { %v85_v40 = vsel %vm84_vm4, %v1149_v30, %v81_v37  ;;  %v88_v41 = vmul.f32 %v1151_v36, %v87_v38 }
 0x108   :  { %v96_v42 = vmul.f32 %v85_v40, %v62_v13 }
 0x109   :  { %v89_v44 = vmul.f32 0.5, %v88_v41 }
 0x10a   :  { %v101_v45 = vmul.f32 %v1139_v39, %v96_v42 }
 0x10b   :  { %v90_v46 = vsub.f32 1.5, %v89_v44 }
 0x10c   :  { %v106_v47 = vadd.f32 %v1140_v43, %v101_v45 }
 0x10d   :  { %v91_v48 = vmul.f32 %v1151_v36, %v90_v46 }
 0x10e   :  { %1081 = vmatmul.msk.f32.vlgmr.msra.gmra.mxu0 %vm46_vm0, %v106_v47 }
 0x10f   :  { %v95_v49 = vsel %vm94_vm7, %v1151_v36, %v91_v48 }
 0x110   :  { %v97_v50 = vmul.f32 %v95_v49, %v63_v18 }
 0x112   :  { %v102_v51 = vmul.f32 %v1139_v39, %v97_v50 }
 0x114   :  { %v107_v52 = vadd.f32 %v1140_v43, %v102_v51 }
 0x116   :  { %1082 = vmatmul.msk.f32.gmra.mxu0 %vm46_vm0, %v107_v52 }
 0x18b   :  { %v1338_v53 = vpop.f32.mrf.mxu0 }
 0x18c   :  { %143 = vrot.lane.b32.xlu2 %v1338_v53, %s1219_s1  ;;  %147 = vrot.lane.b32.xlu1 %v1338_v53, %s1220_s2 }
 0x193   :  { %v1342_v54 = vpop.f32.mrf.mxu0 }
 0x194   :  { %149 = vrot.lane.b32.xlu0 %v1342_v54, %s1220_s2  ;;  %145 = vrot.lane.b32.xlu2 %v1342_v54, %s1219_s1 }
 0x19c   :  { %182 = vrot.lane.b32.xlu0 %v1342_v54, %s1221_s17  ;;  %151 = vrot.lane.b32.xlu2 %v1338_v53, %s1222_s18 }
 0x1a4   :  { %153 = vrot.lane.b32.xlu2 %v1342_v54, %s1222_s18 }
 0x1ac   :  { %155 = vrot.lane.b32.xlu2 %v1338_v53, %s1221_s17 }
 0x1e6   :  { %v1350_v55 = vpop.permute.xlu2 %143 }
 0x1e7   :  { %208 = vrot.lane.b32.xlu2 %v1350_v55, %s1221_s17  ;;  %v1124_v41 = vpack.i.bf16 %v1350_v55, %v1338_v53 }
 0x1ee   :  { %v1353_v56 = vpop.permute.xlu2 %145 }
 0x1ef   :  { %234 = vrot.lane.b32.xlu1 %v1353_v56, %s1221_s17 }
 0x1f6   :  { %v1356_v57 = vpop.permute.xlu2 %151 }
 0x1f7   :  { %312 = vrot.lane.b32.xlu1 %v1356_v57, %s1221_s17 }
 0x1fe   :  { %v1359_v58 = vpop.permute.xlu2 %153  ;;  %v148_v59 = vpop.permute.xlu1 %147 }
 0x1ff   :  { %260 = vrot.lane.b32.xlu2 %v148_v59, %s1221_s17  ;;  %v1129_v27 = vpack.i.bf16 %v1353_v56, %v148_v59 }
 0x206   :  { %v1361_v60 = vpop.permute.xlu0 %149  ;;  %v156_v61 = vpop.permute.xlu2 %155 }
 0x207   :  { %286 = vrot.lane.b32.xlu0 %v1361_v60, %s1221_s17  ;;  %1083 = vmatpush.xpose.msk.msra.mxu2 %vm157_vm8, %v156_v61 }
 0x20a   :  { %1084 = vmatmul.msk.f32.vlgmr.msra.gmra.mxu2 %vm157_vm8, %v1338_v53 }
 0x20e   :  { %v183_v62 = vpop.permute.xlu0 %182 }
 0x20f   :  { %338 = vrot.lane.b32.xlu0 %v1359_v58, %s1221_s17  ;;  %1085 = vmatpush.xpose.msk.msrb.mxu2 %vm157_vm8, %v183_v62 }
 0x212   :  { %1086 = vmatmul.msk.f32.vlgmr.msrb.gmra.mxu2 %vm157_vm8, %v1342_v54 }
 0x241   :  { %v209_v63 = vpop.permute.xlu2 %208 }
 0x242   :  { %1087 = vmatpush.xpose.msk.msra.mxu3 %vm157_vm8, %v209_v63 }
 0x245   :  { %1088 = vmatmul.msk.f32.vlgmr.msra.gmra.mxu3 %vm157_vm8, %v1350_v55 }
 0x259   :  { %v261_v3 = vpop.permute.xlu2 %260 }
 0x261   :  { %v235_v1 = vpop.permute.xlu1 %234 }
 0x262   :  { %1089 = vmatpush.xpose.msk.msra.mxu2 %vm157_vm8, %v235_v1 }
 0x265   :  { %1090 = vmatmul.msk.f32.vlgmr.msra.gmra.mxu2 %vm157_vm8, %v1353_v56 }
 0x266   :  { %1091 = vmatpush.xpose.msk.msrb.mxu2 %vm157_vm8, %v261_v3 }
 0x269   :  { %v313_v5 = vpop.permute.xlu1 %312 }
 0x26d   :  { %1092 = vmatmul.msk.f32.vlgmr.msrb.gmra.mxu2 %vm157_vm8, %v148_v59 }
 0x279   :  { %v287_v4 = vpop.permute.xlu0 %286 }
 0x27a   :  { %1093 = vmatpush.xpose.msk.msrb.mxu3 %vm157_vm8, %v287_v4 }
 0x27d   :  { %1094 = vmatmul.msk.f32.vlgmr.msrb.gmra.mxu3 %vm157_vm8, %v1361_v60 }
 0x27e   :  { %1095 = vmatpush.xpose.msk.msra.mxu3 %vm157_vm8, %v313_v5 }
 0x281   :  { %v339_v6 = vpop.permute.xlu0 %338 }
 0x282   :  { %1097 = vmatpush.xpose.msk.msra.mxu2 %vm157_vm8, %v339_v6  ;;  %v1134_v6 = vpack.i.bf16 %v1356_v57, %v1342_v54 }
 0x285   :  { %1096 = vmatmul.msk.f32.vlgmr.msra.gmra.mxu3 %vm157_vm8, %v1356_v57  ;;  %1098 = vmatmul.msk.f32.vlgmr.msra.gmra.mxu2 %vm157_vm8, %v1359_v58 }
 0x28d   :  { %v179_v7 = vpop.f32.mrf.mxu2 }
 0x28e   :  { %v364_v8 = vsel %vm157_vm8, %v179_v7, -inf }
 0x28f   :  { %365 = vmax.xlane.f32.xlu2 %v364_v8 }
 0x295   :  { %v205_v12 = vpop.f32.mrf.mxu2 }
 0x296   :  { %v367_v13 = vsel %vm157_vm8, %v205_v12, -inf }
 0x2c8   :  { %v231_v9 = vpop.f32.mrf.mxu3 }
 0x2c9   :  { %v370_v11 = vsel %vm157_vm8, %v231_v9, -inf }
 0x2ca   :  { %371 = vmax.xlane.f32.xlu1 %v370_v11 }
 0x2d2   :  { %368 = vmax.xlane.f32.xlu1 %v367_v13 }
 0x2e8   :  { %v257_v14 = vpop.f32.mrf.mxu2 }
 0x2e9   :  { %v373_v15 = vsel %vm157_vm8, %v257_v14, -inf }
 0x2ea   :  { %374 = vmax.xlane.f32.xlu2 %v373_v15 }
 0x2f0   :  { %v283_v23 = vpop.f32.mrf.mxu2 }
 0x2f1   :  { %v376_v24 = vsel %vm157_vm8, %v283_v23, -inf }
 0x300   :  { %v309_v16 = vpop.f32.mrf.mxu3 }
 0x301   :  { %v379_v17 = vsel %vm157_vm8, %v309_v16, -inf }
 0x302   :  { %380 = vmax.xlane.f32.xlu1 %v379_v17  ;;  %v366_v18 = vpop.xlane.xlu2 %365 }
 0x303   :  { %v388_v19 = vsub.f32 %v179_v7, %v366_v18 }
 0x305   :  { %v396_v20 = vmul.f32 1.442695, %v388_v19 }
 0x307   :  { %1152 = vpow2.f32 %v396_v20 }
 0x308   :  { %v335_v25 = vpop.f32.mrf.mxu3  ;;  %v361_v34 = vpop.f32.mrf.mxu2 }
 0x309   :  { %v382_v26 = vsel %vm157_vm8, %v335_v25, -inf  ;;  %v385_v35 = vsel %vm157_vm8, %v361_v34, -inf }
 0x30d   :  { %v1393_v21 = vpop.eup %1152 }
 0x30e   :  { %v412_v22 = vsel %vm157_vm8, %v1393_v21, 0.0 }
 0x30f   :  { %413 = vadd.xlane.f32.xlu0 %v412_v22 }
 0x317   :  { %377 = vmax.xlane.f32.xlu0 %v376_v24 }
 0x31f   :  { %383 = vmax.xlane.f32.xlu0 %v382_v26 }
 0x333   :  { %1130 = vrot.lane.b32.xlu0 %v1129_v27, %s1223_s19 }
 0x33d   :  { %v372_v28 = vpop.xlane.xlu1 %371 }
 0x33e   :  { %v390_v48 = vsub.f32 %v231_v9, %v372_v28 }
 0x340   :  { %v400_v51 = vmul.f32 1.442695, %v390_v48 }
 0x345   :  { %v369_v29 = vpop.xlane.xlu1 %368 }
 0x346   :  { %v389_v30 = vsub.f32 %v205_v12, %v369_v29 }
 0x348   :  { %v398_v31 = vmul.f32 1.442695, %v389_v30 }
 0x34a   :  { %1154 = vpow2.f32 %v398_v31 }
 0x350   :  { %v1401_v32 = vpop.eup %1154 }
 0x351   :  { %v415_v33 = vsel %vm157_vm8, %v1401_v32, 0.0 }
 0x352   :  { %416 = vadd.xlane.f32.xlu2 %v415_v33 }
 0x35a   :  { %386 = vmax.xlane.f32.xlu2 %v385_v35 }
 0x35d   :  { %v375_v36 = vpop.xlane.xlu2 %374 }
 0x35e   :  { %v391_v37 = vsub.f32 %v257_v14, %v375_v36 }
 0x360   :  { %v402_v38 = vmul.f32 1.442695, %v391_v37 }
 0x362   :  { %1156 = vpow2.f32 %v402_v38 }
 0x368   :  { %v1406_v39 = vpop.eup %1156 }
 0x369   :  { %v421_v40 = vsel %vm157_vm8, %v1406_v39, 0.0 }
 0x36a   :  { %422 = vadd.xlane.f32.xlu0 %v421_v40 }
 0x372   :  { %1125 = vrot.lane.b32.xlu2 %v1124_v41, %s1223_s19 }
 0x375   :  { %v381_v42 = vpop.xlane.xlu1 %380 }
 0x376   :  { %v393_v43 = vsub.f32 %v309_v16, %v381_v42 }
 0x378   :  { %v406_v44 = vmul.f32 1.442695, %v393_v43 }
 0x37a   :  { %1158 = vpow2.f32 %v406_v44 }
 0x380   :  { %v1413_v45 = vpop.eup %1158 }
 0x381   :  { %v427_v46 = vsel %vm157_vm8, %v1413_v45, 0.0 }
 0x382   :  { %v414_v47 = vpop.xlane.xlu0 %413  ;;  %428 = vadd.xlane.f32.xlu1 %v427_v46 }
 0x383   :  { %v447_v15 = vand.u32 2147483648, %v414_v47  ;;  %vm441_vm10 = vweird.f32 %v414_v47  ;;  %v445_v17 = vand.u32 2147483647, %v414_v47 }
 0x385   :  { %v448_v54 = vor.u32 1.1754944e-38, %v447_v15  ;;  %vm446_vm12 = vcmp.eq.f32.partialorder %v445_v17, 8.507059e+37 }
 0x38a   :  { %v378_v49 = vpop.xlane.xlu0 %377 }
 0x38b   :  { %v392_v50 = vsub.f32 %v283_v23, %v378_v49 }
 0x38d   :  { %v404_v52 = vmul.f32 1.442695, %v392_v50 }
 0x38f   :  { %1160 = vpow2.f32 %v404_v52 }
 0x390   :  { %1162 = vpow2.f32 %v400_v51 }
 0x392   :  { %v384_v53 = vpop.xlane.xlu0 %383 }
 0x393   :  { %v394_v55 = vsub.f32 %v335_v25, %v384_v53 }
 0x395   :  { %v1417_v56 = vpop.eup %1160  ;;  %v408_v59 = vmul.f32 1.442695, %v394_v55 }
 0x396   :  { %v424_v61 = vsel %vm157_vm8, %v1417_v56, 0.0  ;;  %v1421_v62 = vpop.eup %1162 }
 0x397   :  { %1164 = vpow2.f32 %v408_v59  ;;  %425 = vadd.xlane.f32.xlu1 %v424_v61  ;;  %v418_v63 = vsel %vm157_vm8, %v1421_v62, 0.0 }
 0x398   :  { %1166 = vrcp.f32 %v414_v47 }
 0x39b   :  { %419 = vadd.xlane.f32.xlu2 %v418_v63 }
 0x39d   :  { %v1425_v1 = vpop.eup %1164 }
 0x39e   :  { %v430_v3 = vsel %vm157_vm8, %v1425_v1, 0.0  ;;  %v1167_v7 = vpop.eup %1166 }
 0x39f   :  { %431 = vadd.xlane.f32.xlu1 %v430_v3  ;;  %v437_v8 = vmul.f32 %v1167_v7, %v414_v47  ;;  %vm442_vm9 = vweird.f32 %v1167_v7 }
 0x3a0   :  { %vm443_vm11 = vmor %vm441_vm10, %vm442_vm9 }
 0x3a1   :  { %v438_v9 = vsub.f32 1.0, %v437_v8 }
 0x3a3   :  { %v439_v12 = vmul.f32 %v1167_v7, %v438_v9 }
 0x3a5   :  { %v1131_v4 = vpop.permute.xlu0 %1130  ;;  %v440_v13 = vadd.f32 %v1167_v7, %v439_v12 }
 0x3a6   :  { %v1133_v5 = vunpack.i.h.bf16 %v1131_v4  ;;  %v1132_v25 = vunpack.i.l.bf16 %v1131_v4 }
 0x3a7   :  { %v444_v18 = vsel %vm443_vm11, %v1167_v7, %v440_v13 }
 0x3a8   :  { %655 = vmatpush.msrb.mxu2 %v1133_v5  ;;  %v449_v57 = vsel %vm446_vm12, %v448_v54, %v444_v18 }
 0x3a9   :  { %v450_v23 = vmul.f32 %v1393_v21, %v449_v57 }
 0x3b3   :  { %738 = vrot.lane.b32.xlu2 %v1359_v58, %s1223_s19 }
 0x3b8   :  { %1135 = vrot.lane.b32.xlu1 %v1134_v6, %s1223_s19 }
 0x3c5   :  { %v1434_v11 = vpop.xlane.xlu2 %416 }
 0x3cd   :  { %v387_v14 = vpop.xlane.xlu2 %386 }
 0x3ce   :  { %v395_v16 = vsub.f32 %v361_v34, %v387_v14 }
 0x3d0   :  { %v410_v58 = vmul.f32 1.442695, %v395_v16 }
 0x3d2   :  { %1168 = vpow2.f32 %v410_v58 }
 0x3d5   :  { %v1126_v19 = vpop.permute.xlu2 %1125 }
 0x3d6   :  { %v1127_v20 = vunpack.i.l.bf16 %v1126_v19  ;;  %v1128_v22 = vunpack.i.h.bf16 %v1126_v19 }
 0x3d8   :  { %v1437_v24 = vpop.eup %1168  ;;  %577 = vmatpush.msrb.mxu3 %v1127_v20  ;;  %629 = vmatpush.msra.mxu1 %v1128_v22  ;;  %v460_v22 = vand.u32 2147483647, %v1434_v11 }
 0x3d9   :  { %1099 = vmatmul.msk.f32.vlgmr.msrb.gmra.mxu3 %vm157_vm8, %v450_v23  ;;  %v433_v26 = vsel %vm157_vm8, %v1437_v24, 0.0 }
 0x3da   :  { %681 = vmatpush.msra.mxu3 %v1132_v25  ;;  %434 = vadd.xlane.f32.xlu0 %v433_v26 }
 0x3dd   :  { %v423_v27 = vpop.xlane.xlu0 %422 }
 0x3de   :  { %1170 = vrcp.f32 %v423_v27  ;;  %v492_v31 = vand.u32 2147483648, %v423_v27  ;;  %v490_v21 = vand.u32 2147483647, %v423_v27  ;;  %vm486_vm14 = vweird.f32 %v423_v27 }
 0x3df   :  { %1172 = vrcp.f32 %v1434_v11 }
 0x3e0   :  { %v493_v35 = vor.u32 1.1754944e-38, %v492_v31  ;;  %vm491_vm1 = vcmp.eq.f32.partialorder %v490_v21, 8.507059e+37 }
 0x3e4   :  { %v1171_v28 = vpop.eup %1170 }
 0x3e5   :  { %v482_v29 = vmul.f32 %v1171_v28, %v423_v27  ;;  %vm487_vm13 = vweird.f32 %v1171_v28  ;;  %v1449_v43 = vpop.eup %1172 }
 0x3e6   :  { %vm488_vm15 = vmor %vm486_vm14, %vm487_vm13  ;;  %vm457_vm11 = vweird.f32 %v1449_v43  ;;  %vm456_vm13 = vweird.f32 %v1434_v11 }
 0x3e7   :  { %v483_v30 = vsub.f32 1.0, %v482_v29  ;;  %vm458_vm14 = vmor %vm456_vm13, %vm457_vm11  ;;  %vm790_vm13 = vcmask 130048  }
 0x3e9   :  { %v484_v33 = vmul.f32 %v1171_v28, %v483_v30 }
 0x3eb   :  { %v485_v34 = vadd.f32 %v1171_v28, %v484_v33 }
 0x3ed   :  { %v489_v36 = vsel %vm488_vm15, %v1171_v28, %v485_v34 }
 0x3ee   :  { %v494_v37 = vsel %vm491_vm1, %v493_v35, %v489_v36  ;;  %686 = vrot.lane.b32.xlu0 %v1361_v60, %s1223_s19  ;;  %v452_v60 = vmul.f32 %v1449_v43, %v1434_v11 }
 0x3ef   :  { %v495_v38 = vmul.f32 %v1406_v39, %v494_v37 }
 0x3f0   :  { %v453_v55 = vsub.f32 1.0, %v452_v60 }
 0x3f1   :  { %1102 = vmatmul.msk.f32.vlgmr.msrb.gmra.mxu2 %vm157_vm8, %v495_v38 }
 0x3f2   :  { %v454_v16 = vmul.f32 %v1449_v43, %v453_v55 }
 0x3f4   :  { %v455_v57 = vadd.f32 %v1449_v43, %v454_v16 }
 0x3f5   :  { %v1446_v40 = vpop.xlane.xlu1 %428 }
 0x40a   :  { %v426_v41 = vpop.xlane.xlu1 %425 }
 0x40b   :  { %1174 = vrcp.f32 %v426_v41  ;;  %v505_v49 = vand.u32 2147483647, %v426_v41  ;;  %v507_v50 = vand.u32 2147483648, %v426_v41  ;;  %vm501_vm3 = vweird.f32 %v426_v41 }
 0x40d   :  { %vm506_vm5 = vcmp.eq.f32.partialorder %v505_v49, 8.507059e+37  ;;  %v508_v3 = vor.u32 1.1754944e-38, %v507_v50 }
 0x40e   :  { %v420_v42 = vpop.xlane.xlu2 %419 }
 0x40f   :  { %1176 = vrcp.f32 %v420_v42  ;;  %v477_v4 = vand.u32 2147483648, %v420_v42  ;;  %v475_v5 = vand.u32 2147483647, %v420_v42  ;;  %vm471_vm7 = vweird.f32 %v420_v42 }
 0x411   :  { %v1175_v44 = vpop.eup %1174  ;;  %v478_v15 = vor.u32 1.1754944e-38, %v477_v4  ;;  %vm476_vm10 = vcmp.eq.f32.partialorder %v475_v5, 8.507059e+37 }
 0x412   :  { %v497_v46 = vmul.f32 %v1175_v44, %v426_v41  ;;  %v432_v47 = vpop.xlane.xlu1 %431  ;;  %vm502_vm2 = vweird.f32 %v1175_v44 }
 0x413   :  { %1178 = vrcp.f32 %v432_v47  ;;  %vm503_vm4 = vmor %vm501_vm3, %vm502_vm2  ;;  %v537_v20 = vand.u32 2147483648, %v432_v47  ;;  %vm531_vm15 = vweird.f32 %v432_v47  ;;  %v535_v23 = vand.u32 2147483647, %v432_v47 }
 0x414   :  { %v498_v39 = vsub.f32 1.0, %v497_v46  ;;  %vm461_vm2 = vcmp.eq.f32.partialorder %v460_v22, 8.507059e+37  ;;  %1180 = vrcp.f32 %v1446_v40  ;;  %v1141_v22 = vld [vmem:[%s1611_s5] ss:$0 sm:$0xff] }
 0x415   :  { %v1177_v48 = vpop.eup %1176  ;;  %v538_v27 = vor.u32 1.1754944e-38, %v537_v20  ;;  %vm536_vm3 = vcmp.eq.f32.partialorder %v535_v23, 8.507059e+37 }
 0x416   :  { %v499_v51 = vmul.f32 %v1175_v44, %v498_v39  ;;  %v467_v52 = vmul.f32 %v1177_v48, %v420_v42  ;;  %v739_v53 = vpop.permute.xlu2 %738  ;;  %vm472_vm6 = vweird.f32 %v1177_v48 }
 0x417   :  { %759 = vmatpush.msra.mxu2 %v739_v53  ;;  %vm473_vm9 = vmor %vm471_vm7, %vm472_vm6 }
 0x418   :  { %v500_v59 = vadd.f32 %v1175_v44, %v499_v51  ;;  %v468_v61 = vsub.f32 1.0, %v467_v52 }
 0x419   :  { %v1179_v63 = vpop.eup %1178 }
 0x41a   :  { %v504_v6 = vsel %vm503_vm4, %v1175_v44, %v500_v59  ;;  %v469_v7 = vmul.f32 %v1177_v48, %v468_v61  ;;  %v527_v8 = vmul.f32 %v1179_v63, %v432_v47  ;;  %vm532_vm12 = vweird.f32 %v1179_v63 }
 0x41b   :  { %v509_v9 = vsel %vm506_vm5, %v508_v3, %v504_v6  ;;  %vm533_vm1 = vmor %vm531_vm15, %vm532_vm12  ;;  %vm516_vm5 = vweird.f32 %v1446_v40  ;;  %v520_v44 = vand.u32 2147483647, %v1446_v40 }
 0x41c   :  { %v528_v12 = vsub.f32 1.0, %v527_v8  ;;  %v510_v13 = vmul.f32 %v1417_v56, %v509_v9  ;;  %v470_v14 = vadd.f32 %v1177_v48, %v469_v7  ;;  %v462_v56 = vand.u32 2147483648, %v1434_v11  ;;  %v1181_v11 = vpop.eup %1180  ;;  %v799_v7 = vld [vmem:[%s1610_s4 + $0x18] sm:$0xff]  ;;  %v798_v8 = vld [vmem:[%s1610_s4 + $0x10] sm:$0xff]  ;;  %v797_v9 = vld [vmem:[%s1610_s4 + $0x8] sm:$0xff] }
 0x41d   :  { %v512_v35 = vmul.f32 %v1181_v11, %v1446_v40  ;;  %vm517_vm4 = vweird.f32 %v1181_v11  ;;  %822 = vmatpush.msrb.mxu3 %v799_v7 }
 0x41e   :  { %v529_v17 = vmul.f32 %v1179_v63, %v528_v12  ;;  %1103 = vmatmul.msk.f32.vlgmr.msra.gmra.mxu3 %vm157_vm8, %v510_v13  ;;  %v474_v58 = vsel %vm473_vm9, %v1177_v48, %v470_v14  ;;  %v463_v26 = vor.u32 1.1754944e-38, %v462_v56  ;;  %vm518_vm6 = vmor %vm516_vm5, %vm517_vm4  ;;  %v796_v12 = vld [vmem:[%s1610_s4] sm:$0xff]  ;;  %s1069_s4 = sshll.u32 %s1618_s12, 4  ;;  %s1070_s4 = int_to_ptr.hbm [resolvable:$true] %s1069_s4 }
 0x41f   :  { %v479_v18 = vsel %vm476_vm10, %v478_v15, %v474_v58  ;;  %v513_v37 = vsub.f32 1.0, %v512_v35  ;;  %vm521_vm10 = vcmp.eq.f32.partialorder %v520_v44, 8.507059e+37  ;;  %823 = vmatpush.msrb.mxu3 %v798_v8 }
 0x420   :  { %v480_v54 = vmul.f32 %v1421_v62, %v479_v18  ;;  %v530_v19 = vadd.f32 %v1179_v63, %v529_v17  ;;  %v459_v62 = vsel %vm458_vm14, %v1449_v43, %v455_v57  ;;  %vm793_vm14 = vcmask 195584  }
 0x421   :  { %v464_v28 = vsel %vm461_vm2, %v463_v26, %v459_v62  ;;  %v514_v38 = vmul.f32 %v1181_v11, %v513_v37  ;;  %824 = vmatpush.msrb.mxu3 %v797_v9 }
 0x422   :  { %1101 = vmatmul.msk.f32.vlgmr.msra.gmra.mxu1 %vm157_vm8, %v480_v54  ;;  %v534_v25 = vsel %vm533_vm1, %v1179_v63, %v530_v19  ;;  %v465_v21 = vmul.f32 %v1401_v32, %v464_v28 }
 0x423   :  { %v539_v29 = vsel %vm536_vm3, %v538_v27, %v534_v25  ;;  %v515_v32 = vadd.f32 %v1181_v11, %v514_v38  ;;  %825 = vmatpush.msrb.mxu3 %v796_v12  ;;  %v894_v38 = vld [vmem:[%s1614_s8 + $0x18] sm:$0xff] }
 0x424   :  { %v540_v34 = vmul.f32 %v1425_v1, %v539_v29  ;;  %v522_v1 = vand.u32 2147483648, %v1446_v40 }
 0x425   :  { %v519_v39 = vsel %vm518_vm6, %v1181_v11, %v515_v32  ;;  %v891_v32 = vld [vmem:[%s1614_s8] sm:$0xff] }
 0x426   :  { %v523_v48 = vor.u32 1.1754944e-38, %v522_v1 }
 0x428   :  { %v524_v51 = vsel %vm521_vm10, %v523_v48, %v519_v39 }
 0x429   :  { %v525_v40 = vmul.f32 %v1413_v45, %v524_v51 }
 0x42a   :  { %v1136_v30 = vpop.permute.xlu1 %1135 }
 0x42b   :  { %v1137_v31 = vunpack.i.l.bf16 %v1136_v30  ;;  %v1138_v33 = vunpack.i.h.bf16 %v1136_v30 }
 0x42d   :  { %603 = vmatpush.msrb.mxu0 %v1137_v31  ;;  %733 = vmatpush.msrb.mxu1 %v1138_v33 }
 0x42e   :  { %1100 = vmatmul.msk.f32.vlgmr.msrb.gmra.mxu0 %vm157_vm8, %v465_v21  ;;  %1105 = vmatmul.msk.f32.vlgmr.msrb.gmra.mxu1 %vm157_vm8, %v540_v34 }
 0x44d   :  { %v435_v36 = vpop.xlane.xlu0 %434 }
 0x44e   :  { %1182 = vrcp.f32 %v435_v36  ;;  %v552_v46 = vand.u32 2147483648, %v435_v36  ;;  %v550_v60 = vand.u32 2147483647, %v435_v36  ;;  %vm546_vm9 = vweird.f32 %v435_v36 }
 0x450   :  { %v553_v50 = vor.u32 1.1754944e-38, %v552_v46  ;;  %vm551_vm12 = vcmp.eq.f32.partialorder %v550_v60, 8.507059e+37 }
 0x454   :  { %v1183_v41 = vpop.eup %1182 }
 0x455   :  { %v542_v42 = vmul.f32 %v1183_v41, %v435_v36  ;;  %vm547_vm7 = vweird.f32 %v1183_v41 }
 0x456   :  { %vm548_vm11 = vmor %vm546_vm9, %vm547_vm7 }
 0x457   :  { %v543_v43 = vsub.f32 1.0, %v542_v42  ;;  %v892_v42 = vld [vmem:[%s1614_s8 + $0x8] sm:$0xff] }
 0x459   :  { %v544_v47 = vmul.f32 %v1183_v41, %v543_v43 }
 0x45b   :  { %v545_v49 = vadd.f32 %v1183_v41, %v544_v47 }
 0x45c   :  { %v579_v61 = vpop.f32.mrf.mxu3 }
 0x45d   :  { %v549_v52 = vsel %vm548_vm11, %v1183_v41, %v545_v49  ;;  %v893_v41 = vld [vmem:[%s1614_s8 + $0x10] sm:$0xff] }
 0x45e   :  { %v554_v53 = vsel %vm551_vm12, %v553_v50, %v549_v52  ;;  %v1142_v50 = vld [vmem:[%s1612_s6] ss:$0 sm:$0xff] }
 0x45f   :  { %v555_v55 = vmul.f32 %v1437_v24, %v554_v53  ;;  %v1143_v53 = vld [vmem:[%s1613_s7] ss:$0 sm:$0xff] }
 0x460   :  { %v687_v59 = vpop.permute.xlu0 %686 }
 0x461   :  { %707 = vmatpush.msra.mxu0 %v687_v59  ;;  %1106 = vmatmul.msk.f32.vlgmr.msra.gmra.mxu2 %vm157_vm8, %v555_v55 }
 0x462   :  { %1104 = vmatmul.msk.f32.vlgmr.msra.gmra.mxu0 %vm157_vm8, %v525_v40 }
 0x463   :  { %917 = vmatpush.msrb.mxu0 %v894_v38  ;;  %v1017_v38 = vld [vmem:[%s1616_s10 + $0x8] sm:$0xff] }
 0x465   :  { %918 = vmatpush.msrb.mxu0 %v893_v41 }
 0x467   :  { %919 = vmatpush.msrb.mxu0 %v892_v42  ;;  %v1016_v42 = vld [vmem:[%s1616_s10] sm:$0xff] }
 0x469   :  { %920 = vmatpush.msrb.mxu0 %v891_v32 }
 0x474   :  { %v657_v4 = vpop.f32.mrf.mxu2 }
 0x49f   :  { %v631_v63 = vpop.f32.mrf.mxu1 }
 0x4a0   :  { %766 = vrot.lane.b32.xlu2 %v631_v63, %s1224_s20 }
 0x4a1   :  { %v683_v3 = vpop.f32.mrf.mxu3 }
 0x4a2   :  { %774 = vrot.lane.b32.xlu0 %v683_v3, %s1225_s21 }
 0x4a8   :  { %768 = vrot.lane.b32.xlu2 %v657_v4, %s1224_s20 }
 0x4ab   :  { %v735_v24 = vpop.f32.mrf.mxu1  ;;  %v605_v45 = vpop.f32.mrf.mxu0 }
 0x4ac   :  { %782 = vrot.lane.b32.xlu1 %v735_v24, %s1226_s22 }
 0x4df   :  { %v709_v5 = vpop.f32.mrf.mxu0 }
 0x4e0   :  { %776 = vrot.lane.b32.xlu0 %v709_v5, %s1225_s21 }
 0x4e4   :  { %v761_v6 = vpop.f32.mrf.mxu2 }
 0x4e5   :  { %784 = vrot.lane.b32.xlu1 %v761_v6, %s1226_s22 }
 0x4fa   :  { %v767_v13 = vpop.permute.xlu2 %766 }
 0x4fb   :  { %v788_v15 = vsel %vm157_vm8, %v579_v61, %v767_v13  ;;  %v1030_v13 = vld [vmem:[%s1616_s10 + $0x70] sm:$0xff] }
 0x502   :  { %v769_v18 = vpop.permute.xlu2 %768 }
 0x503   :  { %v789_v57 = vsel %vm157_vm8, %v605_v45, %v769_v18 }
 0x514   :  { %v775_v14 = vpop.permute.xlu0 %774 }
 0x515   :  { %v791_v16 = vsel %vm790_vm13, %v788_v15, %v775_v14  ;;  %v1029_v14 = vld [vmem:[%s1616_s10 + $0x68] sm:$0xff]  ;;  %v1548_v15 = vld [vmem:[%s1615_s9] ss:$0 sm:$0xff] }
 0x51e   :  { %v783_v17 = vpop.permute.xlu1 %782 }
 0x51f   :  { %v794_v58 = vsel %vm793_vm14, %v791_v16, %v783_v17  ;;  %v1028_v16 = vld [vmem:[%s1616_s10 + $0x60] sm:$0xff]  ;;  %v1027_v17 = vld [vmem:[%s1616_s10 + $0x58] sm:$0xff] }
 0x520   :  { %1107 = vmatmul.msk.f32.vlgmr.msrb.gmra.mxu3 %vm46_vm0, %v794_v58 }
 0x552   :  { %v777_v54 = vpop.permute.xlu0 %776 }
 0x553   :  { %v792_v19 = vsel %vm790_vm13, %v789_v57, %v777_v54  ;;  %v1026_v54 = vld [vmem:[%s1616_s10 + $0x50] sm:$0xff] }
 0x557   :  { %v785_v56 = vpop.permute.xlu1 %784 }
 0x558   :  { %v795_v20 = vsel %vm793_vm14, %v792_v19, %v785_v56  ;;  %v1025_v19 = vld [vmem:[%s1616_s10 + $0x48] sm:$0xff] }
 0x559   :  { %1108 = vmatmul.msk.f32.gmra.mxu3 %vm46_vm0, %v795_v20  ;;  %v1024_v20 = vld [vmem:[%s1616_s10 + $0x40] sm:$0xff] }
 0x5a3   :  { %v827_v23 = vpop.f32.mrf.mxu3 }
 0x5a4   :  { %v828_v62 = vadd.f32 %v1141_v22, %v827_v23  ;;  %v1023_v23 = vld [vmem:[%s1616_s10 + $0x38] sm:$0xff] }
 0x5a6   :  { %v1499_v25 = vadd.f32 %v828_v62, %v1297_v0 }
 0x5a8   :  { %v837_v26 = vsel %vm46_vm0, %v1499_v25, 0.0 }
 0x5a9   :  { %838 = vadd.xlane.f32.xlu2 %v837_v26 }
 0x5dc   :  { %v830_v27 = vpop.f32.mrf.mxu3 }
 0x5dd   :  { %v831_v28 = vadd.f32 %v1141_v22, %v830_v27  ;;  %v1022_v27 = vld [vmem:[%s1616_s10 + $0x30] sm:$0xff] }
 0x5df   :  { %v1504_v29 = vadd.f32 %v831_v28, %v1304_v2 }
 0x5e1   :  { %v840_v30 = vsel %vm46_vm0, %v1504_v29, 0.0 }
 0x5e2   :  { %841 = vadd.xlane.f32.xlu0 %v840_v30 }
 0x61c   :  { %v839_v31 = vpop.xlane.xlu2 %838 }
 0x61d   :  { %v843_v33 = vmul.f32 %v839_v31, %v1308_v10  ;;  %v1021_v31 = vld [vmem:[%s1616_s10 + $0x28] sm:$0xff] }
 0x61f   :  { %v845_v21 = vsub.f32 %v1499_v25, %v843_v33 }
 0x621   :  { %v847_v0 = vmul.f32 %v845_v21, %v845_v21 }
 0x623   :  { %v849_v34 = vsel %vm46_vm0, %v847_v0, 0.0  ;;  %v1020_v0 = vld [vmem:[%s1616_s10 + $0x20] sm:$0xff] }
 0x624   :  { %850 = vadd.xlane.f32.xlu1 %v849_v34 }
 0x655   :  { %v842_v11 = vpop.xlane.xlu0 %841 }
 0x656   :  { %v844_v35 = vmul.f32 %v842_v11, %v1308_v10  ;;  %v1019_v11 = vld [vmem:[%s1616_s10 + $0x18] sm:$0xff] }
 0x658   :  { %v846_v36 = vsub.f32 %v1504_v29, %v844_v35 }
 0x65a   :  { %v848_v2 = vmul.f32 %v846_v36, %v846_v36 }
 0x65c   :  { %v852_v37 = vsel %vm46_vm0, %v848_v2, 0.0  ;;  %v1018_v2 = vld [vmem:[%s1616_s10 + $0x10] sm:$0xff] }
 0x65d   :  { %853 = vadd.xlane.f32.xlu2 %v852_v37 }
 0x697   :  { %v851_v1 = vpop.xlane.xlu1 %850 }
 0x698   :  { %v855_v43 = vmul.f32 %v851_v1, %v1308_v10 }
 0x69a   :  { %v857_v44 = vadd.f32 1e-05, %v855_v43 }
 0x69c   :  { %1184 = vrsqrt.f32 %v857_v44  ;;  %vm865_vm15 = vweird.f32 %v857_v44 }
 0x6a2   :  { %v1185_v46 = vpop.eup %1184 }
 0x6a3   :  { %v860_v47 = vmul.f32 %v1185_v46, %v857_v44  ;;  %vm866_vm8 = vweird.f32 %v1185_v46 }
 0x6a4   :  { %vm867_vm1 = vmor %vm865_vm15, %vm866_vm8 }
 0x6a5   :  { %v861_v60 = vmul.f32 %v1185_v46, %v860_v47 }
 0x6a7   :  { %v862_v39 = vmul.f32 0.5, %v861_v60 }
 0x6a9   :  { %v863_v48 = vsub.f32 1.5, %v862_v39 }
 0x6ab   :  { %v864_v49 = vmul.f32 %v1185_v46, %v863_v48 }
 0x6ad   :  { %v868_v51 = vsel %vm867_vm1, %v1185_v46, %v864_v49 }
 0x6ae   :  { %v879_v52 = vmul.f32 %v868_v51, %v845_v21 }
 0x6b0   :  { %v884_v55 = vmul.f32 %v1142_v50, %v879_v52 }
 0x6b2   :  { %v889_v59 = vadd.f32 %v1143_v53, %v884_v55 }
 0x6b4   :  { %1109 = vmatmul.msk.f32.vlgmr.msrb.gmra.mxu0 %vm46_vm0, %v889_v59 }
 0x6d0   :  { %v854_v40 = vpop.xlane.xlu2 %853 }
 0x6d1   :  { %v856_v61 = vmul.f32 %v854_v40, %v1308_v10  ;;  %v1031_v10 = vld [vmem:[%s1616_s10 + $0x78] sm:$0xff] }
 0x6d2   :  { %1036 = vmatpush.msra.mxu1 %v1031_v10 }
 0x6d3   :  { %v858_v63 = vadd.f32 1e-05, %v856_v61 }
 0x6d4   :  { %1037 = vmatpush.msra.mxu1 %v1030_v13 }
 0x6d5   :  { %1186 = vrsqrt.f32 %v858_v63  ;;  %vm875_vm3 = vweird.f32 %v858_v63 }
 0x6d6   :  { %1038 = vmatpush.msra.mxu1 %v1029_v14 }
 0x6d8   :  { %1039 = vmatpush.msra.mxu1 %v1028_v16 }
 0x6da   :  { %1040 = vmatpush.msra.mxu1 %v1027_v17 }
 0x6db   :  { %v1187_v3 = vpop.eup %1186 }
 0x6dc   :  { %v870_v4 = vmul.f32 %v1187_v3, %v858_v63  ;;  %vm876_vm2 = vweird.f32 %v1187_v3  ;;  %1041 = vmatpush.msra.mxu1 %v1026_v54 }
 0x6dd   :  { %vm877_vm4 = vmor %vm875_vm3, %vm876_vm2 }
 0x6de   :  { %v871_v24 = vmul.f32 %v1187_v3, %v870_v4  ;;  %1042 = vmatpush.msra.mxu1 %v1025_v19 }
 0x6e0   :  { %v872_v45 = vmul.f32 0.5, %v871_v24  ;;  %1043 = vmatpush.msra.mxu1 %v1024_v20 }
 0x6e2   :  { %v873_v5 = vsub.f32 1.5, %v872_v45  ;;  %1044 = vmatpush.msra.mxu1 %v1023_v23 }
 0x6e4   :  { %v874_v6 = vmul.f32 %v1187_v3, %v873_v5  ;;  %1045 = vmatpush.msra.mxu1 %v1022_v27 }
 0x6e6   :  { %v878_v7 = vsel %vm877_vm4, %v1187_v3, %v874_v6  ;;  %1046 = vmatpush.msra.mxu1 %v1021_v31 }
 0x6e7   :  { %v880_v8 = vmul.f32 %v878_v7, %v846_v36 }
 0x6e8   :  { %1047 = vmatpush.msra.mxu1 %v1020_v0 }
 0x6e9   :  { %v885_v9 = vmul.f32 %v1142_v50, %v880_v8 }
 0x6ea   :  { %1048 = vmatpush.msra.mxu1 %v1019_v11 }
 0x6eb   :  { %v890_v12 = vadd.f32 %v1143_v53, %v885_v9 }
 0x6ec   :  { %1049 = vmatpush.msra.mxu1 %v1018_v2 }
 0x6ed   :  { %1110 = vmatmul.msk.f32.gmra.mxu0 %vm46_vm0, %v890_v12 }
 0x6ee   :  { %1050 = vmatpush.msra.mxu1 %v1017_v38 }
 0x6f0   :  { %1051 = vmatpush.msra.mxu1 %v1016_v42 }
 0x731   :  { %v922_v58 = vpop.f32.mrf.mxu0 }
 0x732   :  { %v1557_v18 = vadd.f32 %v1548_v15, %v922_v58 }
 0x734   :  { %v930_v57 = vmul.f32 0.70710677, %v1557_v18  ;;  %v928_v45 = vmul.f32 0.5, %v1557_v18 }
 0x736   :  { %v932_v56 = vmul.f32 %v930_v57, %v930_v57 }
 0x738   :  { %v933_v22 = vmin.f32 %v932_v56, 16.0 }
 0x73a   :  { %v934_v62 = vmul.f32 2.1237322e-06, %v933_v22  ;;  %v945_v26 = vmul.f32 3.8918573e-05, %v933_v22 }
 0x73c   :  { %v935_v28 = vadd.f32 0.00028619796, %v934_v62  ;;  %v946_v30 = vadd.f32 0.001143296, %v945_v26 }
 0x73e   :  { %v936_v33 = vmul.f32 %v935_v28, %v933_v22  ;;  %v947_v21 = vmul.f32 %v946_v30, %v933_v22 }
 0x740   :  { %v948_v34 = vadd.f32 0.014752088, %v947_v21  ;;  %v937_v35 = vadd.f32 0.0036580483, %v936_v33 }
 0x742   :  { %v949_v36 = vmul.f32 %v948_v34, %v933_v22  ;;  %v938_v41 = vmul.f32 %v937_v35, %v933_v22 }
 0x744   :  { %v950_v37 = vadd.f32 0.112945676, %v949_v36  ;;  %v939_v43 = vadd.f32 0.05243302, %v938_v41 }
 0x746   :  { %v951_v32 = vmul.f32 %v950_v37, %v933_v22  ;;  %v940_v47 = vmul.f32 %v939_v43, %v933_v22 }
 0x748   :  { %v952_v1 = vadd.f32 0.4994258, %v951_v32  ;;  %v941_v60 = vadd.f32 0.18741608, %v940_v47 }
 0x74a   :  { %v953_v44 = vmul.f32 %v952_v1, %v933_v22  ;;  %v942_v48 = vmul.f32 %v941_v60, %v933_v22 }
 0x74c   :  { %v954_v46 = vadd.f32 1.0, %v953_v44  ;;  %v943_v52 = vadd.f32 1.1283791, %v942_v48 }
 0x74e   :  { %1188 = vrcp.f32 %v954_v46  ;;  %v966_v51 = vand.u32 2147483648, %v954_v46  ;;  %v964_v55 = vand.u32 2147483647, %v954_v46  ;;  %vm960_vm6 = vweird.f32 %v954_v46 }
 0x74f   :  { %v944_v61 = vmul.f32 %v943_v52, %v930_v57 }
 0x750   :  { %v967_v40 = vor.u32 1.1754944e-38, %v966_v51  ;;  %vm965_vm9 = vcmp.eq.f32.partialorder %v964_v55, 8.507059e+37 }
 0x754   :  { %v1189_v39 = vpop.eup %1188 }
 0x755   :  { %v956_v49 = vmul.f32 %v1189_v39, %v954_v46  ;;  %vm961_vm5 = vweird.f32 %v1189_v39  ;;  %v1145_v46 = vld [vmem:[%s1617_s11] ss:$0 sm:$0xff]  ;;  %s1228_s11 = smov 128  }
 0x756   :  { %vm962_vm7 = vmor %vm960_vm6, %vm961_vm5 }
 0x757   :  { %v957_v50 = vsub.f32 1.0, %v956_v49 }
 0x759   :  { %v958_v53 = vmul.f32 %v1189_v39, %v957_v50 }
 0x75b   :  { %v959_v59 = vadd.f32 %v1189_v39, %v958_v53 }
 0x75d   :  { %v963_v63 = vsel %vm962_vm7, %v1189_v39, %v959_v59 }
 0x75e   :  { %v968_v3 = vsel %vm965_vm9, %v967_v40, %v963_v63 }
 0x75f   :  { %v969_v4 = vmul.f32 %v968_v3, %v944_v61 }
 0x761   :  { %v1111_v24 = vclamps-f32 %v969_v4, 1.0 }
 0x763   :  { %v1012_v5 = vadd.f32 1.0, %v1111_v24 }
 0x765   :  { %v1014_v6 = vmul.f32 %v1012_v5, %v928_v45 }
 0x767   :  { %1052 = vmatmul.f32.vlgmr.msra.gmra.mxu1 %v1014_v6 }
 0x76a   :  { %v925_v7 = vpop.f32.mrf.mxu0 }
 0x76b   :  { %v926_v8 = vadd.f32 %v1548_v15, %v925_v7 }
 0x76d   :  { %v931_v9 = vmul.f32 0.70710677, %v926_v8  ;;  %v929_v1 = vmul.f32 0.5, %v926_v8 }
 0x76f   :  { %v972_v12 = vmul.f32 %v931_v9, %v931_v9 }
 0x771   :  { %v973_v10 = vmin.f32 %v972_v12, 16.0 }
 0x773   :  { %v974_v13 = vmul.f32 2.1237322e-06, %v973_v10  ;;  %v985_v14 = vmul.f32 3.8918573e-05, %v973_v10 }
 0x775   :  { %v975_v16 = vadd.f32 0.00028619796, %v974_v13  ;;  %v986_v17 = vadd.f32 0.001143296, %v985_v14 }
 0x777   :  { %v976_v58 = vmul.f32 %v975_v16, %v973_v10  ;;  %v987_v54 = vmul.f32 %v986_v17, %v973_v10 }
 0x779   :  { %v988_v57 = vadd.f32 0.014752088, %v987_v54  ;;  %v977_v19 = vadd.f32 0.0036580483, %v976_v58 }
 0x77b   :  { %v989_v56 = vmul.f32 %v988_v57, %v973_v10  ;;  %v978_v18 = vmul.f32 %v977_v19, %v973_v10 }
 0x77d   :  { %v990_v20 = vadd.f32 0.112945676, %v989_v56  ;;  %v979_v62 = vadd.f32 0.05243302, %v978_v18 }
 0x77f   :  { %v991_v22 = vmul.f32 %v990_v20, %v973_v10  ;;  %v980_v15 = vmul.f32 %v979_v62, %v973_v10 }
 0x781   :  { %v992_v23 = vadd.f32 0.4994258, %v991_v22  ;;  %v981_v28 = vadd.f32 0.18741608, %v980_v15 }
 0x783   :  { %v993_v26 = vmul.f32 %v992_v23, %v973_v10  ;;  %v982_v31 = vmul.f32 %v981_v28, %v973_v10 }
 0x785   :  { %v994_v27 = vadd.f32 1.0, %v993_v26  ;;  %v983_v34 = vadd.f32 1.1283791, %v982_v31 }
 0x787   :  { %1190 = vrcp.f32 %v994_v27  ;;  %v1006_v0 = vand.u32 2147483648, %v994_v27  ;;  %v1004_v35 = vand.u32 2147483647, %v994_v27  ;;  %vm1000_vm11 = vweird.f32 %v994_v27 }
 0x788   :  { %v984_v37 = vmul.f32 %v983_v34, %v931_v9 }
 0x789   :  { %v1007_v2 = vor.u32 1.1754944e-38, %v1006_v0  ;;  %vm1005_vm13 = vcmp.eq.f32.partialorder %v1004_v35, 8.507059e+37 }
 0x78d   :  { %v1191_v30 = vpop.eup %1190 }
 0x78e   :  { %v996_v33 = vmul.f32 %v1191_v30, %v994_v27  ;;  %vm1001_vm10 = vweird.f32 %v1191_v30 }
 0x78f   :  { %vm1002_vm12 = vmor %vm1000_vm11, %vm1001_vm10 }
 0x790   :  { %v997_v21 = vsub.f32 1.0, %v996_v33 }
 0x792   :  { %v998_v11 = vmul.f32 %v1191_v30, %v997_v21 }
 0x794   :  { %v999_v36 = vadd.f32 %v1191_v30, %v998_v11 }
 0x796   :  { %v1003_v38 = vsel %vm1002_vm12, %v1191_v30, %v999_v36 }
 0x797   :  { %v1008_v41 = vsel %vm1005_vm13, %v1007_v2, %v1003_v38 }
 0x798   :  { %v1009_v42 = vmul.f32 %v1008_v41, %v984_v37 }
 0x79a   :  { %v1112_v32 = vclamps-f32 %v1009_v42, 1.0 }
 0x79c   :  { %v1013_v43 = vadd.f32 1.0, %v1112_v32 }
 0x79e   :  { %v1015_v44 = vmul.f32 %v1013_v43, %v929_v1 }
 0x7a0   :  { %1055 = vmatmul.f32.gmra.mxu1 %v1015_v44 }
 0x7e4   :  { %v1053_v47 = vpop.f32.mrf.mxu1 }
 0x7e5   :  { %v1054_v60 = vadd.f32 %v1145_v46, %v1053_v47 }
 0x7e7   :  { %v1059_v39 = vadd.f32 %v1054_v60, %v1499_v25 }
 0x7e9   :  { %1061 = vst.msk [vmem:[#allocation2] sm:$0xff] %vm46_vm0, %v1059_v39 }
 0x81d   :  { %v1056_v48 = vpop.f32.mrf.mxu1 }
 0x81e   :  { %v1057_v49 = vadd.f32 %v1145_v46, %v1056_v48 }
 0x820   :  { %v1060_v50 = vadd.f32 %v1057_v49, %v1504_v29 }
 0x822   :  { %1062 = vst.msk [vmem:[#allocation2 + $0x8] sm:$0xff] %vm46_vm0, %v1060_v50 }
 0x823   :  { %1075 = dma.vmem_to_hbm [thread:$0]  %s1068_s27, 256, %s1070_s4, [#allocation3], %s1228_s11, %s1228_s11, %s1224_s20  }
 0x824   :  { %1216 = dma.done.wait [#allocation3], 256  }
 0x825   :  { %1217 = vsyncadd [#allocation3], 4294967040 }
 0x826   :  { %1080 = vsyncpa [#allocation3], 1 }

</bundles_post_ra>
